<compile_context>
chip_gen: v7x
topology: tpu7x:2x2x1
jax: 0.10.0
libtpu: 0.0.40
codegen_flags: <defaults>
</compile_context>

<pallas_src>
import numpy as np
import jax
import jax.numpy as jnp
from jax.experimental import pallas as pl
from jax.experimental.pallas import tpu as pltpu

BN_EPS = 1e-5


def _round_up(x, m):
    return ((x + m - 1) // m) * m


def _cdiv(a, b):
    return -(-a // b)


def _choose_tile_m(n):
    # Per-grid-step pipeline overhead (~0.35 us) dominates the tiny per-layer
    # compute, so use big batch tiles; keep >= 2 grid steps where possible so
    # both v7x TensorCores get work (axis marked "parallel").
    if n >= 512:
        return min(1024, _round_up(_cdiv(n, 2), 256))
    if n >= 32:
        return _round_up(_cdiv(n, 2), 16)       # two 16-aligned (bf16) tiles
    return _round_up(max(n, 1), 16)             # one small 16-aligned tile


# ----------------------------------------------------------------------------
# Kernel: whole encoder forward fused.  One grid step processes a
# (tile_m, din_pad) batch tile; the stacked weights/shifts are VMEM-resident
# across all steps.  The layer loop is unrolled at trace time (static indices).
# ----------------------------------------------------------------------------
def make_encoder_kernel(block_has_projection, din_pad):
    """block_has_projection: list[bool], one entry per residual block."""

    def kernel(x_ref, w_ref, s_ref, out_ref):
        D = w_ref.shape[1]

        def layer(h_bf16, l, rows=None, cols=None):
            rows = D if rows is None else rows
            cols = D if cols is None else cols
            w = w_ref[l, :rows, :cols]                 # bf16 MXU operand (static slice)
            s = s_ref[l:l + 1, :cols]                  # fp32 folded bias + BN shift
            return jnp.dot(h_bf16, w, preferred_element_type=jnp.float32) + s

        relu = lambda v: jnp.maximum(v, 0.0)           # fp32 (safe on v5e too)
        bf16 = lambda v: v.astype(jnp.bfloat16)        # cast once per activation

        # input_layer (+folded input_norm) -> relu.  x is only din_pad wide; the
        # contraction uses just the first din_pad rows of the weight tile.
        h = bf16(relu(layer(x_ref[...], 0, rows=din_pad)))
        li = 1

        # residual blocks (dropout = identity in eval mode)
        for has_proj in block_has_projection:
            if has_proj:
                # fused [linear1(+bn1) | projection] : one (D, 2D) matmul
                y = layer(h, li, cols=2 * D); li += 1
                out = bf16(relu(y[:, :D]))
                identity_f32 = y[:, D:]
            else:
                out = bf16(relu(layer(h, li))); li += 1
                identity_f32 = h.astype(jnp.float32)
            out2 = layer(out, li); li += 1             # linear2 (+bn2), fp32 acc
            h = bf16(relu(out2 + identity_f32))        # residual add in fp32

        # output_layer -> bf16 writeback
        out_ref[...] = layer(h, li).astype(out_ref.dtype)

    return kernel


# ----------------------------------------------------------------------------
# Raw parameter construction (deterministic, synthetic, PyTorch-like layout).
# ----------------------------------------------------------------------------
def _lin(key, din, dout):
    kw, kb = jax.random.split(key)
    w = jax.random.normal(kw, (din, dout), jnp.float32) * (1.0 / np.sqrt(din))
    b = 0.1 * jax.random.normal(kb, (dout,), jnp.float32)
    return w, b


def _bn(key, dim):
    kg, kb, km, kv = jax.random.split(key, 4)
    gamma = 1.0 + 0.1 * jax.random.normal(kg, (dim,), jnp.float32)
    beta = 0.1 * jax.random.normal(kb, (dim,), jnp.float32)
    mean = 0.1 * jax.random.normal(km, (dim,), jnp.float32)
    var = 1.0 + 0.1 * jnp.abs(jax.random.normal(kv, (dim,), jnp.float32))
    return gamma, beta, mean, var


def build_raw_params(key, input_dim, hidden_dims, output_dim):
    keys = iter(jax.random.split(key, 4 + 8 * len(hidden_dims)))
    raw = {"input": _lin(next(keys), input_dim, hidden_dims[0]),
           "input_bn": _bn(next(keys), hidden_dims[0]),
           "blocks": []}
    block_has_projection = []
    for i in range(len(hidden_dims) - 1):
        din, dout = hidden_dims[i], hidden_dims[i + 1]
        blk = {
            "l1": _lin(next(keys), din, dout),
            "bn1": _bn(next(keys), dout),
            "l2": _lin(next(keys), dout, dout),
            "bn2": _bn(next(keys), dout),
            "proj": _lin(next(keys), din, dout) if din != dout else None,
        }
        raw["blocks"].append(blk)
        block_has_projection.append(din != dout)
    raw["output"] = _lin(next(keys), hidden_dims[-1], output_dim)
    return raw, block_has_projection


# ----------------------------------------------------------------------------
# Fold BN (eval) + bias into weights, pad to lane-dense D, stack all layers.
# Each stacked step is (D, 2D): left half = main linear, right half = fused
# projection for dim-changing blocks (zeros and never read otherwise).
# ----------------------------------------------------------------------------
def _fold_linear_bn(w, b, bn_params=None):
    if bn_params is None:
        return w, b
    gamma, beta, mean, var = bn_params
    scale = gamma / jnp.sqrt(var + BN_EPS)
    shift = beta - mean * scale
    return w * scale[None, :], b * scale + shift


def fold_and_pack(raw, D):
    steps = [[_fold_linear_bn(*raw["input"], raw["input_bn"])]]
    for blk in raw["blocks"]:
        l1 = _fold_linear_bn(*blk["l1"], blk["bn1"])
        if blk["proj"] is not None:
            steps.append([l1, _fold_linear_bn(*blk["proj"])])   # fused step
        else:
            steps.append([l1])
        steps.append([_fold_linear_bn(*blk["l2"], blk["bn2"])])
    steps.append([_fold_linear_bn(*raw["output"])])

    L = len(steps)
    w_stack = np.zeros((L, D, 2 * D), np.float32)
    s_stack = np.zeros((L, 2 * D), np.float32)
    for i, parts in enumerate(steps):
        for half, (w, s) in enumerate(parts):
            w = np.asarray(w); s = np.asarray(s)
            w_stack[i, :w.shape[0], half * D: half * D + w.shape[1]] = w
            s_stack[i, half * D: half * D + s.shape[0]] = s
    return jnp.asarray(w_stack, jnp.bfloat16), jnp.asarray(s_stack, jnp.float32)


# ----------------------------------------------------------------------------
# pallas_call wrapper: batch-tiled parallel grid, resident (single-buffered)
# weights, bf16 lane-dense output.
# ----------------------------------------------------------------------------
def residual_molecular_encoder_padded(x, w_stack, s_stack, block_has_projection):
    """Returns the lane-padded (n_pad, D) bf16 output block and the true n."""
    n, din = x.shape
    L, D, W2 = w_stack.shape

    din_pad = max(16, _round_up(din, 16))      # bf16 sublane multiple, NOT 128
    tile_m = _choose_tile_m(n)
    n_pad = _round_up(n, tile_m)

    # Only batch-pad (and pad features to a 16-multiple); no lane-pad to 128.
    if n_pad == n and din_pad == din:
        x_p = x.astype(jnp.bfloat16)
    else:
        x_p = jnp.zeros((n_pad, din_pad), jnp.bfloat16).at[:n, :din].set(
            x.astype(jnp.bfloat16))

    # Cost estimate (advisory).
    flops = 2 * n_pad * din_pad * D
    for has_proj in block_has_projection:
        flops += 2 * n_pad * D * (2 * D if has_proj else D)   # linear1 (+proj)
        flops += 2 * n_pad * D * D                            # linear2
    flops += 2 * n_pad * D * D                                # output layer
    bytes_accessed = (n_pad * din_pad * 2      # x   (bf16)
                      + L * D * W2 * 2         # weights (bf16)
                      + L * W2 * 4             # shifts  (fp32)
                      + n_pad * D * 2)         # output  (bf16)

    kernel = make_encoder_kernel(block_has_projection, din_pad)
    buffered = getattr(pl, "Buffered", None)

    def run(single_buffer_weights):
        if single_buffer_weights and buffered is not None:
            # Grid-invariant operands: no point double-buffering the resident copy.
            w_spec = pl.BlockSpec((L, D, W2), lambda i: (0, 0, 0),
                                  pipeline_mode=buffered(1))
            s_spec = pl.BlockSpec((L, W2), lambda i: (0, 0),
                                  pipeline_mode=buffered(1))
        else:
            w_spec = pl.BlockSpec((L, D, W2), lambda i: (0, 0, 0))
            s_spec = pl.BlockSpec((L, W2), lambda i: (0, 0))
        return pl.pallas_call(
            kernel,
            out_shape=jax.ShapeDtypeStruct((n_pad, D), jnp.bfloat16),
            grid=(n_pad // tile_m,),
            in_specs=[
                pl.BlockSpec((tile_m, din_pad), lambda i: (i, 0)),  # batch tile
                w_spec,                                             # resident weights
                s_spec,                                             # resident shifts
            ],
            out_specs=pl.BlockSpec((tile_m, D), lambda i: (i, 0)),
            compiler_params=pltpu.CompilerParams(
                dimension_semantics=("parallel",)),
            cost_estimate=pl.CostEstimate(flops=flops, transcendentals=0,
                                          bytes_accessed=bytes_accessed),
        )(x_p, w_stack, s_stack)

    try:
        out = run(True)
    except Exception:
        # TODO(synk): pl.Buffered(1) rejected by this JAX/Mosaic build; fall back
        #             to default double-buffering (same semantics, ~2x weight VMEM).
        out = run(False)
    return out, n


def residual_molecular_encoder(x, w_stack, s_stack, block_has_projection,
                               output_dim):
    out_padded, n = residual_molecular_encoder_padded(
        x, w_stack, s_stack, block_has_projection)
    # Consumers that can tolerate the lane-padded bf16 block should use
    # residual_molecular_encoder_padded directly and fuse this slice.
    return out_padded[:n, :output_dim]


# ----------------------------------------------------------------------------
# References.
# ----------------------------------------------------------------------------
def reference_folded_bf16(x, w_stack, s_stack, block_has_projection, output_dim):
    """Exact-math mirror of the kernel (folded, fused, bf16 activations)."""
    n, din = x.shape
    L, D, W2 = w_stack.shape
    din_pad = max(16, _round_up(din, 16))
    xp = jnp.zeros((n, din_pad), jnp.bfloat16).at[:, :din].set(
        x.astype(jnp.bfloat16))

    def layer(h, l, rows=None, cols=None):
        rows = D if rows is None else rows
        cols = D if cols is None else cols
        return (jnp.dot(h, w_stack[l, :rows, :cols],
                        preferred_element_type=jnp.float32)
                + s_stack[l, :cols][None, :])

    relu = lambda v: jnp.maximum(v, 0.0)
    bf16 = lambda v: v.astype(jnp.bfloat16)

    h = bf16(relu(layer(xp, 0, rows=din_pad)))
    li = 1
    for has_proj in block_has_projection:
        if has_proj:
            y = layer(h, li, cols=2 * D); li += 1
            out = bf16(relu(y[:, :D]))
            identity = y[:, D:]
        else:
            out = bf16(relu(layer(h, li))); li += 1
            identity = h.astype(jnp.float32)
        out2 = layer(out, li); li += 1
        h = bf16(relu(out2 + identity))
    return layer(h, li).astype(jnp.bfloat16)[:, :output_dim]


def reference_fp32(x, raw):
    """fp32 un-folded reference of the original module's eval-mode math."""
    relu = lambda v: jnp.maximum(v, 0.0)
    lin = lambda v, p: v @ p[0] + p[1]

    def bn(v, p):
        g, b, m, var = p
        return (v - m) / jnp.sqrt(var + BN_EPS) * g + b

    h = relu(bn(lin(x, raw["input"]), raw["input_bn"]))
    for blk in raw["blocks"]:
        identity = h
        out = relu(bn(lin(h, blk["l1"]), blk["bn1"]))
        out = bn(lin(out, blk["l2"]), blk["bn2"])
        if blk["proj"] is not None:
            identity = lin(identity, blk["proj"])
        h = relu(out + identity)
    return lin(h, raw["output"])


if __name__ == "__main__":
    batch = 8
    input_dim = 32
    hidden_dims = [64, 64, 32]   # block0: 64->64 (no projection), block1: 64->32 (projection)
    output_dim = 16

    key = jax.random.PRNGKey(0)
    kx, kp = jax.random.split(key)
    x = jax.random.normal(kx, (batch, input_dim), jnp.float32)

    raw, block_has_projection = build_raw_params(kp, input_dim, hidden_dims,
                                                 output_dim)
    D = _round_up(max([input_dim, output_dim] + hidden_dims), 128)
    w_stack, s_stack = fold_and_pack(raw, D)

    out = residual_molecular_encoder(x, w_stack, s_stack, block_has_projection,
                                     output_dim)
    out = jax.block_until_ready(out)
    out_f32 = np.asarray(out.astype(jnp.float32))

    # 1) Tight check vs. the exact-math mirror of the kernel.
    ref_mirror = reference_folded_bf16(x, w_stack, s_stack,
                                       block_has_projection, output_dim)
    np.testing.assert_allclose(out_f32,
                               np.asarray(ref_mirror.astype(jnp.float32)),
                               rtol=2e-2, atol=2e-2)

    # 2) Loose check vs. the fp32 un-folded original-module semantics
    #    (tolerance relaxed because matmuls/activations/output are bf16).
    ref32 = reference_fp32(x, raw)
    np.testing.assert_allclose(out_f32, np.asarray(ref32),
                               rtol=1e-1, atol=1e-1)

    print("KERNEL_OK")
</pallas_src>

<mosaic_0001>
module attributes {stable_mosaic.version = 11 : i64} {
  func.func @kernel(%arg0: i32, %arg1: memref<16x32xbf16, #tpu.memory_space<vmem>>, %arg2: memref<6x128x256xbf16, #tpu.memory_space<vmem>>, %arg3: memref<6x256xf32, #tpu.memory_space<vmem>>, %arg4: memref<16x128xbf16, #tpu.memory_space<vmem>>) attributes {dimension_semantics = [#tpu.dimension_semantics<parallel>], iteration_bounds = array<i64: 1>, scalar_prefetch = 0 : i64, scratch_operands = 0 : i64, tpu.core_type = #tpu.core_type<tc>, window_params = [{transform_indices = @transform_0, window_bounds = array<i64: 16, 32>}, {pipeline_mode = #tpu.pipeline_mode<synchronous>, transform_indices = @transform_1, window_bounds = array<i64: 6, 128, 256>}, {pipeline_mode = #tpu.pipeline_mode<synchronous>, transform_indices = @transform_2, window_bounds = array<i64: 6, 256>}, {transform_indices = @transform_3, window_bounds = array<i64: 16, 128>}]} {
    %c0 = arith.constant 0 : index
    %c0_0 = arith.constant 0 : index
    %0 = vector.load %arg1[%c0, %c0_0] : memref<16x32xbf16, #tpu.memory_space<vmem>>, vector<16x32xbf16>
    %c0_1 = arith.constant 0 : index
    %c0_2 = arith.constant 0 : index
    %c0_3 = arith.constant 0 : index
    %1 = vector.load %arg2[%c0_1, %c0_2, %c0_3] : memref<6x128x256xbf16, #tpu.memory_space<vmem>>, vector<1x32x128xbf16>
    %2 = vector.shape_cast %1 : vector<1x32x128xbf16> to vector<32x128xbf16>
    %c0_4 = arith.constant 0 : index
    %c0_5 = arith.constant 0 : index
    %3 = vector.load %arg3[%c0_4, %c0_5] : memref<6x256xf32, #tpu.memory_space<vmem>>, vector<1x128xf32>
    %cst = arith.constant dense<0.000000e+00> : vector<16x128xf32>
    %4 = tpu.matmul %0, %2, %cst {dimension_numbers = #tpu.dot_dimension_numbers<[1], [0], [0], [1], [0, 0, 1, 1], [], []>} : vector<16x32xbf16>, vector<32x128xbf16>, vector<16x128xf32> -> vector<16x128xf32>
    %5 = vector.broadcast %3 : vector<1x128xf32> to vector<16x128xf32>
    %6 = arith.addf %4, %5 : vector<16x128xf32>
    %cst_6 = arith.constant 0.000000e+00 : f32
    %7 = vector.broadcast %cst_6 : f32 to vector<16x128xf32>
    %8 = arith.maximumf %6, %7 : vector<16x128xf32>
    %9 = arith.truncf %8 : vector<16x128xf32> to vector<16x128xbf16>
    %c1 = arith.constant 1 : index
    %c0_7 = arith.constant 0 : index
    %c0_8 = arith.constant 0 : index
    %10 = vector.load %arg2[%c1, %c0_7, %c0_8] : memref<6x128x256xbf16, #tpu.memory_space<vmem>>, vector<1x128x128xbf16>
    %11 = vector.shape_cast %10 : vector<1x128x128xbf16> to vector<128x128xbf16>
    %c1_9 = arith.constant 1 : index
    %c0_10 = arith.constant 0 : index
    %12 = vector.load %arg3[%c1_9, %c0_10] : memref<6x256xf32, #tpu.memory_space<vmem>>, vector<1x128xf32>
    %cst_11 = arith.constant dense<0.000000e+00> : vector<16x128xf32>
    %13 = tpu.matmul %9, %11, %cst_11 {dimension_numbers = #tpu.dot_dimension_numbers<[1], [0], [0], [1], [0, 0, 1, 1], [], []>} : vector<16x128xbf16>, vector<128x128xbf16>, vector<16x128xf32> -> vector<16x128xf32>
    %14 = vector.broadcast %12 : vector<1x128xf32> to vector<16x128xf32>
    %15 = arith.addf %13, %14 : vector<16x128xf32>
    %cst_12 = arith.constant 0.000000e+00 : f32
    %16 = vector.broadcast %cst_12 : f32 to vector<16x128xf32>
    %17 = arith.maximumf %15, %16 : vector<16x128xf32>
    %18 = arith.truncf %17 : vector<16x128xf32> to vector<16x128xbf16>
    %19 = arith.extf %9 : vector<16x128xbf16> to vector<16x128xf32>
    %c2 = arith.constant 2 : index
    %c0_13 = arith.constant 0 : index
    %c0_14 = arith.constant 0 : index
    %20 = vector.load %arg2[%c2, %c0_13, %c0_14] : memref<6x128x256xbf16, #tpu.memory_space<vmem>>, vector<1x128x128xbf16>
    %21 = vector.shape_cast %20 : vector<1x128x128xbf16> to vector<128x128xbf16>
    %c2_15 = arith.constant 2 : index
    %c0_16 = arith.constant 0 : index
    %22 = vector.load %arg3[%c2_15, %c0_16] : memref<6x256xf32, #tpu.memory_space<vmem>>, vector<1x128xf32>
    %cst_17 = arith.constant dense<0.000000e+00> : vector<16x128xf32>
    %23 = tpu.matmul %18, %21, %cst_17 {dimension_numbers = #tpu.dot_dimension_numbers<[1], [0], [0], [1], [0, 0, 1, 1], [], []>} : vector<16x128xbf16>, vector<128x128xbf16>, vector<16x128xf32> -> vector<16x128xf32>
    %24 = vector.broadcast %22 : vector<1x128xf32> to vector<16x128xf32>
    %25 = arith.addf %23, %24 : vector<16x128xf32>
    %26 = arith.addf %25, %19 : vector<16x128xf32>
    %cst_18 = arith.constant 0.000000e+00 : f32
    %27 = vector.broadcast %cst_18 : f32 to vector<16x128xf32>
    %28 = arith.maximumf %26, %27 : vector<16x128xf32>
    %29 = arith.truncf %28 : vector<16x128xf32> to vector<16x128xbf16>
    %c3 = arith.constant 3 : index
    %c0_19 = arith.constant 0 : index
    %c0_20 = arith.constant 0 : index
    %30 = vector.load %arg2[%c3, %c0_19, %c0_20] : memref<6x128x256xbf16, #tpu.memory_space<vmem>>, vector<1x128x256xbf16>
    %31 = vector.shape_cast %30 : vector<1x128x256xbf16> to vector<128x256xbf16>
    %c3_21 = arith.constant 3 : index
    %c0_22 = arith.constant 0 : index
    %32 = vector.load %arg3[%c3_21, %c0_22] : memref<6x256xf32, #tpu.memory_space<vmem>>, vector<1x256xf32>
    %cst_23 = arith.constant dense<0.000000e+00> : vector<16x256xf32>
    %33 = tpu.matmul %29, %31, %cst_23 {dimension_numbers = #tpu.dot_dimension_numbers<[1], [0], [0], [1], [0, 0, 1, 1], [], []>} : vector<16x128xbf16>, vector<128x256xbf16>, vector<16x256xf32> -> vector<16x256xf32>
    %34 = vector.broadcast %32 : vector<1x256xf32> to vector<16x256xf32>
    %35 = arith.addf %33, %34 : vector<16x256xf32>
    %36 = vector.extract_strided_slice %35 {offsets = [0, 0], sizes = [16, 128], strides = [1, 1]} : vector<16x256xf32> to vector<16x128xf32>
    %cst_24 = arith.constant 0.000000e+00 : f32
    %37 = vector.broadcast %cst_24 : f32 to vector<16x128xf32>
    %38 = arith.maximumf %36, %37 : vector<16x128xf32>
    %39 = arith.truncf %38 : vector<16x128xf32> to vector<16x128xbf16>
    %40 = vector.extract_strided_slice %35 {offsets = [0, 128], sizes = [16, 128], strides = [1, 1]} : vector<16x256xf32> to vector<16x128xf32>
    %c4 = arith.constant 4 : index
    %c0_25 = arith.constant 0 : index
    %c0_26 = arith.constant 0 : index
    %41 = vector.load %arg2[%c4, %c0_25, %c0_26] : memref<6x128x256xbf16, #tpu.memory_space<vmem>>, vector<1x128x128xbf16>
    %42 = vector.shape_cast %41 : vector<1x128x128xbf16> to vector<128x128xbf16>
    %c4_27 = arith.constant 4 : index
    %c0_28 = arith.constant 0 : index
    %43 = vector.load %arg3[%c4_27, %c0_28] : memref<6x256xf32, #tpu.memory_space<vmem>>, vector<1x128xf32>
    %cst_29 = arith.constant dense<0.000000e+00> : vector<16x128xf32>
    %44 = tpu.matmul %39, %42, %cst_29 {dimension_numbers = #tpu.dot_dimension_numbers<[1], [0], [0], [1], [0, 0, 1, 1], [], []>} : vector<16x128xbf16>, vector<128x128xbf16>, vector<16x128xf32> -> vector<16x128xf32>
    %45 = vector.broadcast %43 : vector<1x128xf32> to vector<16x128xf32>
    %46 = arith.addf %44, %45 : vector<16x128xf32>
    %47 = arith.addf %46, %40 : vector<16x128xf32>
    %cst_30 = arith.constant 0.000000e+00 : f32
    %48 = vector.broadcast %cst_30 : f32 to vector<16x128xf32>
    %49 = arith.maximumf %47, %48 : vector<16x128xf32>
    %50 = arith.truncf %49 : vector<16x128xf32> to vector<16x128xbf16>
    %c5 = arith.constant 5 : index
    %c0_31 = arith.constant 0 : index
    %c0_32 = arith.constant 0 : index
    %51 = vector.load %arg2[%c5, %c0_31, %c0_32] : memref<6x128x256xbf16, #tpu.memory_space<vmem>>, vector<1x128x128xbf16>
    %52 = vector.shape_cast %51 : vector<1x128x128xbf16> to vector<128x128xbf16>
    %c5_33 = arith.constant 5 : index
    %c0_34 = arith.constant 0 : index
    %53 = vector.load %arg3[%c5_33, %c0_34] : memref<6x256xf32, #tpu.memory_space<vmem>>, vector<1x128xf32>
    %cst_35 = arith.constant dense<0.000000e+00> : vector<16x128xf32>
    %54 = tpu.matmul %50, %52, %cst_35 {dimension_numbers = #tpu.dot_dimension_numbers<[1], [0], [0], [1], [0, 0, 1, 1], [], []>} : vector<16x128xbf16>, vector<128x128xbf16>, vector<16x128xf32> -> vector<16x128xf32>
    %55 = vector.broadcast %53 : vector<1x128xf32> to vector<16x128xf32>
    %56 = arith.addf %54, %55 : vector<16x128xf32>
    %57 = arith.truncf %56 : vector<16x128xf32> to vector<16x128xbf16>
    %c0_36 = arith.constant 0 : index
    %c0_37 = arith.constant 0 : index
    %58 = vector.load %arg4[%c0_36, %c0_37] : memref<16x128xbf16, #tpu.memory_space<vmem>>, vector<16x128xbf16>
    tpu.vector_store %arg4[%c0_36, %c0_37], %57 {strides = array<i32>} : memref<16x128xbf16, #tpu.memory_space<vmem>>, vector<16x128xbf16>,
    return
  }
  func.func @transform_0(%arg0: i32) -> (i32, i32) {
    %c0_i32 = arith.constant 0 : i32
    %c0_i32_0 = arith.constant 0 : i32
    return %arg0, %c0_i32 : i32, i32
  }
  func.func @transform_1(%arg0: i32) -> (i32, i32, i32) {
    %c0_i32 = arith.constant 0 : i32
    %c0_i32_0 = arith.constant 0 : i32
    %c0_i32_1 = arith.constant 0 : i32
    %c0_i32_2 = arith.constant 0 : i32
    return %c0_i32, %c0_i32_0, %c0_i32_1 : i32, i32, i32
  }
  func.func @transform_2(%arg0: i32) -> (i32, i32) {
    %c0_i32 = arith.constant 0 : i32
    %c0_i32_0 = arith.constant 0 : i32
    %c0_i32_1 = arith.constant 0 : i32
    return %c0_i32, %c0_i32_0 : i32, i32
  }
  func.func @transform_3(%arg0: i32) -> (i32, i32) {
    %c0_i32 = arith.constant 0 : i32
    %c0_i32_0 = arith.constant 0 : i32
    return %arg0, %c0_i32 : i32, i32
  }
}

module attributes {stable_mosaic.version = 11 : i64} {
  func.func @kernel(%arg0: i32, %arg1: memref<16x32xbf16, #tpu.memory_space<vmem>>, %arg2: memref<6x128x256xbf16, #tpu.memory_space<vmem>>, %arg3: memref<6x256xf32, #tpu.memory_space<vmem>>, %arg4: memref<16x128xbf16, #tpu.memory_space<vmem>>) attributes {dimension_semantics = [#tpu.dimension_semantics<parallel>], iteration_bounds = array<i64: 1>, scalar_prefetch = 0 : i64, scratch_operands = 0 : i64, tpu.core_type = #tpu.core_type<tc>, window_params = [{transform_indices = @transform_0, window_bounds = array<i64: 16, 32>}, {pipeline_mode = #tpu.pipeline_mode<synchronous>, transform_indices = @transform_1, window_bounds = array<i64: 6, 128, 256>}, {pipeline_mode = #tpu.pipeline_mode<synchronous>, transform_indices = @transform_2, window_bounds = array<i64: 6, 256>}, {transform_indices = @transform_3, window_bounds = array<i64: 16, 128>}]} {
    %c0 = arith.constant 0 : index
    %c0_0 = arith.constant 0 : index
    %0 = vector.load %arg1[%c0, %c0_0] : memref<16x32xbf16, #tpu.memory_space<vmem>>, vector<16x32xbf16>
    %c0_1 = arith.constant 0 : index
    %c0_2 = arith.constant 0 : index
    %c0_3 = arith.constant 0 : index
    %1 = vector.load %arg2[%c0_1, %c0_2, %c0_3] : memref<6x128x256xbf16, #tpu.memory_space<vmem>>, vector<1x32x128xbf16>
    %2 = vector.shape_cast %1 : vector<1x32x128xbf16> to vector<32x128xbf16>
    %c0_4 = arith.constant 0 : index
    %c0_5 = arith.constant 0 : index
    %3 = vector.load %arg3[%c0_4, %c0_5] : memref<6x256xf32, #tpu.memory_space<vmem>>, vector<1x128xf32>
    %cst = arith.constant dense<0.000000e+00> : vector<16x128xf32>
    %4 = tpu.matmul %0, %2, %cst {dimension_numbers = #tpu.dot_dimension_numbers<[1], [0], [0], [1], [0, 0, 1, 1], [], []>} : vector<16x32xbf16>, vector<32x128xbf16>, vector<16x128xf32> -> vector<16x128xf32>
    %5 = vector.broadcast %3 : vector<1x128xf32> to vector<16x128xf32>
    %6 = arith.addf %4, %5 : vector<16x128xf32>
    %cst_6 = arith.constant 0.000000e+00 : f32
    %7 = vector.broadcast %cst_6 : f32 to vector<16x128xf32>
    %8 = arith.maximumf %6, %7 : vector<16x128xf32>
    %9 = arith.truncf %8 : vector<16x128xf32> to vector<16x128xbf16>
    %c1 = arith.constant 1 : index
    %c0_7 = arith.constant 0 : index
    %c0_8 = arith.constant 0 : index
    %10 = vector.load %arg2[%c1, %c0_7, %c0_8] : memref<6x128x256xbf16, #tpu.memory_space<vmem>>, vector<1x128x128xbf16>
    %11 = vector.shape_cast %10 : vector<1x128x128xbf16> to vector<128x128xbf16>
    %c1_9 = arith.constant 1 : index
    %c0_10 = arith.constant 0 : index
    %12 = vector.load %arg3[%c1_9, %c0_10] : memref<6x256xf32, #tpu.memory_space<vmem>>, vector<1x128xf32>
    %cst_11 = arith.constant dense<0.000000e+00> : vector<16x128xf32>
    %13 = tpu.matmul %9, %11, %cst_11 {dimension_numbers = #tpu.dot_dimension_numbers<[1], [0], [0], [1], [0, 0, 1, 1], [], []>} : vector<16x128xbf16>, vector<128x128xbf16>, vector<16x128xf32> -> vector<16x128xf32>
    %14 = vector.broadcast %12 : vector<1x128xf32> to vector<16x128xf32>
    %15 = arith.addf %13, %14 : vector<16x128xf32>
    %cst_12 = arith.constant 0.000000e+00 : f32
    %16 = vector.broadcast %cst_12 : f32 to vector<16x128xf32>
    %17 = arith.maximumf %15, %16 : vector<16x128xf32>
    %18 = arith.truncf %17 : vector<16x128xf32> to vector<16x128xbf16>
    %19 = arith.extf %9 : vector<16x128xbf16> to vector<16x128xf32>
    %c2 = arith.constant 2 : index
    %c0_13 = arith.constant 0 : index
    %c0_14 = arith.constant 0 : index
    %20 = vector.load %arg2[%c2, %c0_13, %c0_14] : memref<6x128x256xbf16, #tpu.memory_space<vmem>>, vector<1x128x128xbf16>
    %21 = vector.shape_cast %20 : vector<1x128x128xbf16> to vector<128x128xbf16>
    %c2_15 = arith.constant 2 : index
    %c0_16 = arith.constant 0 : index
    %22 = vector.load %arg3[%c2_15, %c0_16] : memref<6x256xf32, #tpu.memory_space<vmem>>, vector<1x128xf32>
    %cst_17 = arith.constant dense<0.000000e+00> : vector<16x128xf32>
    %23 = tpu.matmul %18, %21, %cst_17 {dimension_numbers = #tpu.dot_dimension_numbers<[1], [0], [0], [1], [0, 0, 1, 1], [], []>} : vector<16x128xbf16>, vector<128x128xbf16>, vector<16x128xf32> -> vector<16x128xf32>
    %24 = vector.broadcast %22 : vector<1x128xf32> to vector<16x128xf32>
    %25 = arith.addf %23, %24 : vector<16x128xf32>
    %26 = arith.addf %25, %19 : vector<16x128xf32>
    %cst_18 = arith.constant 0.000000e+00 : f32
    %27 = vector.broadcast %cst_18 : f32 to vector<16x128xf32>
    %28 = arith.maximumf %26, %27 : vector<16x128xf32>
    %29 = arith.truncf %28 : vector<16x128xf32> to vector<16x128xbf16>
    %c3 = arith.constant 3 : index
    %c0_19 = arith.constant 0 : index
    %c0_20 = arith.constant 0 : index
    %30 = vector.load %arg2[%c3, %c0_19, %c0_20] : memref<6x128x256xbf16, #tpu.memory_space<vmem>>, vector<1x128x256xbf16>
    %31 = vector.shape_cast %30 : vector<1x128x256xbf16> to vector<128x256xbf16>
    %c3_21 = arith.constant 3 : index
    %c0_22 = arith.constant 0 : index
    %32 = vector.load %arg3[%c3_21, %c0_22] : memref<6x256xf32, #tpu.memory_space<vmem>>, vector<1x256xf32>
    %cst_23 = arith.constant dense<0.000000e+00> : vector<16x256xf32>
    %33 = tpu.matmul %29, %31, %cst_23 {dimension_numbers = #tpu.dot_dimension_numbers<[1], [0], [0], [1], [0, 0, 1, 1], [], []>} : vector<16x128xbf16>, vector<128x256xbf16>, vector<16x256xf32> -> vector<16x256xf32>
    %34 = vector.broadcast %32 : vector<1x256xf32> to vector<16x256xf32>
    %35 = arith.addf %33, %34 : vector<16x256xf32>
    %36 = vector.extract_strided_slice %35 {offsets = [0, 0], sizes = [16, 128], strides = [1, 1]} : vector<16x256xf32> to vector<16x128xf32>
    %cst_24 = arith.constant 0.000000e+00 : f32
    %37 = vector.broadcast %cst_24 : f32 to vector<16x128xf32>
    %38 = arith.maximumf %36, %37 : vector<16x128xf32>
    %39 = arith.truncf %38 : vector<16x128xf32> to vector<16x128xbf16>
    %40 = vector.extract_strided_slice %35 {offsets = [0, 128], sizes = [16, 128], strides = [1, 1]} : vector<16x256xf32> to vector<16x128xf32>
    %c4 = arith.constant 4 : index
    %c0_25 = arith.constant 0 : index
    %c0_26 = arith.constant 0 : index
    %41 = vector.load %arg2[%c4, %c0_25, %c0_26] : memref<6x128x256xbf16, #tpu.memory_space<vmem>>, vector<1x128x128xbf16>
    %42 = vector.shape_cast %41 : vector<1x128x128xbf16> to vector<128x128xbf16>
    %c4_27 = arith.constant 4 : index
    %c0_28 = arith.constant 0 : index
    %43 = vector.load %arg3[%c4_27, %c0_28] : memref<6x256xf32, #tpu.memory_space<vmem>>, vector<1x128xf32>
    %cst_29 = arith.constant dense<0.000000e+00> : vector<16x128xf32>
    %44 = tpu.matmul %39, %42, %cst_29 {dimension_numbers = #tpu.dot_dimension_numbers<[1], [0], [0], [1], [0, 0, 1, 1], [], []>} : vector<16x128xbf16>, vector<128x128xbf16>, vector<16x128xf32> -> vector<16x128xf32>
    %45 = vector.broadcast %43 : vector<1x128xf32> to vector<16x128xf32>
    %46 = arith.addf %44, %45 : vector<16x128xf32>
    %47 = arith.addf %46, %40 : vector<16x128xf32>
    %cst_30 = arith.constant 0.000000e+00 : f32
    %48 = vector.broadcast %cst_30 : f32 to vector<16x128xf32>
    %49 = arith.maximumf %47, %48 : vector<16x128xf32>
    %50 = arith.truncf %49 : vector<16x128xf32> to vector<16x128xbf16>
    %c5 = arith.constant 5 : index
    %c0_31 = arith.constant 0 : index
    %c0_32 = arith.constant 0 : index
    %51 = vector.load %arg2[%c5, %c0_31, %c0_32] : memref<6x128x256xbf16, #tpu.memory_space<vmem>>, vector<1x128x128xbf16>
    %52 = vector.shape_cast %51 : vector<1x128x128xbf16> to vector<128x128xbf16>
    %c5_33 = arith.constant 5 : index
    %c0_34 = arith.constant 0 : index
    %53 = vector.load %arg3[%c5_33, %c0_34] : memref<6x256xf32, #tpu.memory_space<vmem>>, vector<1x128xf32>
    %cst_35 = arith.constant dense<0.000000e+00> : vector<16x128xf32>
    %54 = tpu.matmul %50, %52, %cst_35 {dimension_numbers = #tpu.dot_dimension_numbers<[1], [0], [0], [1], [0, 0, 1, 1], [], []>} : vector<16x128xbf16>, vector<128x128xbf16>, vector<16x128xf32> -> vector<16x128xf32>
    %55 = vector.broadcast %53 : vector<1x128xf32> to vector<16x128xf32>
    %56 = arith.addf %54, %55 : vector<16x128xf32>
    %57 = arith.truncf %56 : vector<16x128xf32> to vector<16x128xbf16>
    %c0_36 = arith.constant 0 : index
    %c0_37 = arith.constant 0 : index
    %58 = vector.load %arg4[%c0_36, %c0_37] : memref<16x128xbf16, #tpu.memory_space<vmem>>, vector<16x128xbf16>
    tpu.vector_store %arg4[%c0_36, %c0_37], %57 {strides = array<i32>} : memref<16x128xbf16, #tpu.memory_space<vmem>>, vector<16x128xbf16>,
    return
  }
  func.func @transform_0(%arg0: i32) -> (i32, i32) {
    %c0_i32 = arith.constant 0 : i32
    %c0_i32_0 = arith.constant 0 : i32
    return %arg0, %c0_i32 : i32, i32
  }
  func.func @transform_1(%arg0: i32) -> (i32, i32, i32) {
    %c0_i32 = arith.constant 0 : i32
    %c0_i32_0 = arith.constant 0 : i32
    %c0_i32_1 = arith.constant 0 : i32
    %c0_i32_2 = arith.constant 0 : i32
    return %c0_i32, %c0_i32_0, %c0_i32_1 : i32, i32, i32
  }
  func.func @transform_2(%arg0: i32) -> (i32, i32) {
    %c0_i32 = arith.constant 0 : i32
    %c0_i32_0 = arith.constant 0 : i32
    %c0_i32_1 = arith.constant 0 : i32
    return %c0_i32, %c0_i32_0 : i32, i32
  }
  func.func @transform_3(%arg0: i32) -> (i32, i32) {
    %c0_i32 = arith.constant 0 : i32
    %c0_i32_0 = arith.constant 0 : i32
    return %arg0, %c0_i32 : i32, i32
  }
}

</mosaic_0001>

<bundles_post_ra>
// kernel: tpu_custom_call.1
= control target key start
LH: loop header
LB: loop body
LE: loop exit
PB: predicated region body
PF: predicated region fallthrough
CT: control target
= control target key end

     0   :  { %8 = vsyncpa [#allocation3], 0  ;;  %s1240_s0 = inlined_call_operand.hbm [shape: bf16[16,32], index: 0, kind: input, shape index: {}]   ;;  %s1241_s1 = inlined_call_operand.hbm [shape: bf16[6,128,256], index: 1, kind: input, shape index: {}]   ;;  %s1242_s2 = inlined_call_operand.hbm [shape: f32[6,256], index: 2, kind: input, shape index: {}]   ;;  %s1243_s3 = inlined_call_operand.hbm [shape: bf16[16,128], index: 3, kind: output, shape index: {}]  }
   0x1   :  { %9 = vsyncpa [#allocation6], 0 }
   0x2   :  { %10 = vsyncpa [#allocation4], 0  ;;  %s1106_s12 = smov [#allocation5]   ;;  %s1012_s16 = scalar_lea.hbm %s1241_s1, 12288 }
   0x3   :  { %s28_s13 = sshll.u32 %s1106_s12, 4  ;;  %p1013_p0 = scmp.ne.s32.totalorder %s1241_s1, %s1012_s16  ;;  %s29_s13 = int_to_ptr.vmem [resolvable:$true] %s28_s13 }
   0x4   :  { %p1016_p1 = scmp.lt.u32.totalorder %s1012_s16, %s1241_s1 }
   0x6   :  { %p1018_p2 = pnand %p1016_p1, %p1013_p0 }
   0x8   :  { %1021 = shalt.err (!%p1018_p2)
}
   0x9   :  { %s1022_s21 = scalar_lea.vmem %s29_s13, 12288  ;;  %p1027_p4 = scmp.lt.s32.totalorder %s29_s13, %s29_s13 }
   0xa   :  { %p1023_p3 = scmp.ne.s32.totalorder %s29_s13, %s1022_s21  ;;  %p1028_p5 = scmp.lt.s32.totalorder %s1022_s21, %s1022_s21 }
   0xc   :  { %p1029_p6 = por %p1028_p5, %p1027_p4 }
   0xe   :  { %p1030_p7 = pnand %p1029_p6, %p1023_p3 }
  0x10   :  { %1033 = shalt.err (!%p1030_p7)
}
  0x11   :  { %s1107_s22 = smov 128   ;;  %s1108_s23 = smov 8  }
  0x12   :  { %34 = dma.hbm_to_vmem [thread:$0]  %s1241_s1, 12288, %s29_s13, [#allocation6], %s1107_s22, %s1107_s22, %s1108_s23  }
  0x13   :  { %s1109_s26 = smov [#allocation2]   ;;  %s1034_s30 = scalar_lea.hbm %s1240_s0, 128 }
  0x14   :  { %s16_s27 = sshll.u32 %s1109_s26, 4  ;;  %p1035_p8 = scmp.ne.s32.totalorder %s1240_s0, %s1034_s30  ;;  %s17_s27 = int_to_ptr.vmem [resolvable:$true] %s16_s27 }
  0x15   :  { %p1038_p9 = scmp.lt.u32.totalorder %s1034_s30, %s1240_s0 }
  0x17   :  { %p1040_p10 = pnand %p1038_p9, %p1035_p8 }
  0x19   :  { %1043 = shalt.err (!%p1040_p10)
}
  0x1a   :  { %s1044_s8 = scalar_lea.vmem %s17_s27, 128  ;;  %p1049_p12 = scmp.lt.s32.totalorder %s17_s27, %s17_s27 }
  0x1b   :  { %p1045_p11 = scmp.ne.s32.totalorder %s17_s27, %s1044_s8  ;;  %p1050_p13 = scmp.lt.s32.totalorder %s1044_s8, %s1044_s8 }
  0x1d   :  { %p1051_p0 = por %p1050_p13, %p1049_p12 }
  0x1f   :  { %p1052_p1 = pnand %p1051_p0, %p1045_p11 }
  0x21   :  { %1055 = shalt.err (!%p1052_p1)
}
  0x22   :  { %s1110_s1 = smov 64   ;;  %s1111_s9 = smov 4  }
  0x23   :  { %22 = dma.hbm_to_vmem [thread:$0]  %s1240_s0, 128, %s17_s27, [#allocation3], %s1110_s1, %s1110_s1, %s1111_s9  }
  0x24   :  { %s1112_s12 = smov [#allocation7]   ;;  %s1056_s16 = scalar_lea.hbm %s1242_s2, 256 }
  0x25   :  { %s41_s13 = sshll.u32 %s1112_s12, 4  ;;  %p1057_p2 = scmp.ne.s32.totalorder %s1242_s2, %s1056_s16  ;;  %s42_s13 = int_to_ptr.vmem [resolvable:$true] %s41_s13 }
  0x26   :  { %p1060_p3 = scmp.lt.u32.totalorder %s1056_s16, %s1242_s2 }
  0x28   :  { %p1062_p4 = pnand %p1060_p3, %p1057_p2 }
  0x2a   :  { %1065 = shalt.err (!%p1062_p4)
}
  0x2b   :  { %s1066_s21 = scalar_lea.vmem %s42_s13, 256  ;;  %p1071_p6 = scmp.lt.s32.totalorder %s42_s13, %s42_s13 }
  0x2c   :  { %p1067_p5 = scmp.ne.s32.totalorder %s42_s13, %s1066_s21  ;;  %p1072_p7 = scmp.lt.s32.totalorder %s1066_s21, %s1066_s21 }
  0x2e   :  { %p1073_p8 = por %p1072_p7, %p1071_p6 }
  0x30   :  { %p1074_p9 = pnand %p1073_p8, %p1067_p5 }
  0x32   :  { %1077 = shalt.err (!%p1074_p9)
}
  0x33   :  { %44 = dma.hbm_to_vmem [thread:$0]  %s1242_s2, 256, %s42_s13, [#allocation6]  }
  0x34   :  { %1100 = dma.done.wait [#allocation3], 128  }
  0x35   :  { %1101 = vsyncadd [#allocation3], 4294967168 }
  0x36   :  { %1102 = dma.done.wait [#allocation6], 12544  }
  0x37   :  { %1103 = vsyncadd [#allocation6], 4294954752  ;;  %v1113_v0 = vmov 0.0   ;;  %vm1114_vm0 = vmmov 0   ;;  %v953_v1 = vld [vmem:[#allocation5] ss:$8 sps:$4 sm:$0xff]  }
  0x38   :  { %854 = vmatprep.subr.bf16.mxu0 %v1113_v0  ;;  %858 = vmatprep.mubr.msk.bf16.mxu0 %vm1114_vm0, %v1113_v0  ;;  %v954_v2 = vld [vmem:[#allocation5 + $0x10] ss:$8 sps:$4 sm:$0xff]   ;;  %v956_v3 = vld [vmem:[#allocation5 + $0x80] ss:$8 sps:$4 sm:$0xff]   ;;  %vm79_vm1 = vcmask 261120   ;;  %v1115_v56 = vmov 0  }
  0x39   :  { %862 = vmatprep.subr.bf16.mxu1 %v1113_v0  ;;  %878 = vmatprep.mubr.msk.bf16.mxu1 %vm1114_vm0, %v1113_v0  ;;  %v955_v4 = vld [vmem:[#allocation2] sm:$0xff]   ;;  %v958_v6 = vld [vmem:[#allocation5 + $0xa0] ss:$8 sps:$4 sm:$0xff]   ;;  %v974_v31 = vld [vmem:[#allocation5 + $0x184] ss:$8 sps:$4 sm:$0xff]   ;;  %s1116_s2 = smov [#allocation8]  }
  0x3a   :  { %855 = vmatpush3.bf16.msra.mxu0 %v953_v1  ;;  %863 = vmatpush3.bf16.msra.mxu1 %v956_v3  ;;  %v957_v5 = vld [vmem:[#allocation5 + $0x90] ss:$8 sps:$4 sm:$0xff]   ;;  %v960_v8 = vld [vmem:[#allocation5 + $0xc0] ss:$8 sps:$4 sm:$0xff]   ;;  %v977_v32 = vld [vmem:[#allocation5 + $0x194] ss:$8 sps:$4 sm:$0xff]  }
  0x3b   :  { %856 = vmatprep.subr.bf16.mxu0 %v1113_v0  ;;  %864 = vmatprep.subr.bf16.mxu1 %v1113_v0  ;;  %v959_v7 = vld [vmem:[#allocation5 + $0xb0] ss:$8 sps:$4 sm:$0xff]   ;;  %v962_v10 = vld [vmem:[#allocation5 + $0xe0] ss:$8 sps:$4 sm:$0xff]   ;;  %v980_v34 = vld [vmem:[#allocation5 + $0x1a4] ss:$8 sps:$4 sm:$0xff]  }
  0x3c   :  { %v961_v9 = vld [vmem:[#allocation5 + $0xd0] ss:$8 sps:$4 sm:$0xff]   ;;  %v964_v12 = vld [vmem:[#allocation5 + $0x100] ss:$8 sps:$4 sm:$0xff]   ;;  %v983_v36 = vld [vmem:[#allocation5 + $0x1b4] ss:$8 sps:$4 sm:$0xff]  }
  0x3d   :  { %v963_v11 = vld [vmem:[#allocation5 + $0xf0] ss:$8 sps:$4 sm:$0xff]   ;;  %v966_v14 = vld [vmem:[#allocation5 + $0x120] ss:$8 sps:$4 sm:$0xff]   ;;  %v986_v38 = vld [vmem:[#allocation5 + $0x1c4] ss:$8 sps:$4 sm:$0xff]  }
  0x3e   :  { %857 = vmatpush3.bf16.msra.mxu0 %v954_v2  ;;  %865 = vmatpush3.bf16.msra.mxu1 %v957_v5  ;;  %v965_v13 = vld [vmem:[#allocation5 + $0x110] ss:$8 sps:$4 sm:$0xff]   ;;  %v968_v16 = vld [vmem:[#allocation5 + $0x140] ss:$8 sps:$4 sm:$0xff]   ;;  %v989_v40 = vld [vmem:[#allocation5 + $0x1d4] ss:$8 sps:$4 sm:$0xff]  }
  0x3f   :  { %882 = vmatprep.subr.bf16.mxu0 %v1113_v0  ;;  %866 = vmatprep.subr.bf16.mxu1 %v1113_v0  ;;  %v967_v15 = vld [vmem:[#allocation5 + $0x130] ss:$8 sps:$4 sm:$0xff]   ;;  %v61_v18 = vld [vmem:[#allocation7] ss:$0 sm:$0xff]  ;;  %v144_v42 = vld [vmem:[#allocation7 + $0x1] ss:$0 sm:$0xff] }
  0x40   :  { %v969_v17 = vld [vmem:[#allocation5 + $0x150] ss:$8 sps:$4 sm:$0xff]   ;;  %v970_v28 = vld [vmem:[#allocation5 + $0x160] ss:$8 sps:$4 sm:$0xff]   ;;  %v992_v52 = vld [vmem:[#allocation5 + $0x1e4] ss:$8 sps:$4 sm:$0xff]  }
  0x41   :  { %859 = vmatmul.mubr.msk.bf16.vlgmr.msra.gmra.mrb[0].mxu0 %vm79_vm1, %v955_v4  ;;  %v971_v29 = vld [vmem:[#allocation5 + $0x170] ss:$8 sps:$4 sm:$0xff]   ;;  %v972_v30 = vld [vmem:[#allocation5 + $0x180] ss:$8 sps:$4 sm:$0xff]   ;;  %v995_v54 = vld [vmem:[#allocation5 + $0x1f4] ss:$8 sps:$4 sm:$0xff]  }
  0x42   :  { %898 = vmatprep.mubr.msk.bf16.mxu0 %vm1114_vm0, %v1113_v0  ;;  %867 = vmatpush3.bf16.msra.mxu1 %v958_v6  ;;  %v975_v33 = vld [vmem:[#allocation5 + $0x190] ss:$8 sps:$4 sm:$0xff]   ;;  %v978_v35 = vld [vmem:[#allocation5 + $0x1a0] ss:$8 sps:$4 sm:$0xff]   ;;  %s741_s23 = sshll.u32 %s1116_s2, 4  ;;  %s742_s23 = int_to_ptr.vmem [resolvable:$true] %s741_s23 }
  0x43   :  { %868 = vmatprep.subr.bf16.mxu1 %v1113_v0  ;;  %883 = vmatpush3.bf16.msra.mxu0 %v964_v12  ;;  %v981_v37 = vld [vmem:[#allocation5 + $0x1b0] ss:$8 sps:$4 sm:$0xff]   ;;  %v984_v39 = vld [vmem:[#allocation5 + $0x1c0] ss:$8 sps:$4 sm:$0xff]   ;;  %s1078_s24 = scalar_lea.vmem %s742_s23, 128  ;;  %p1083_p11 = scmp.lt.s32.totalorder %s742_s23, %s742_s23 }
  0x44   :  { %884 = vmatprep.subr.bf16.mxu0 %v1113_v0  ;;  %v987_v41 = vld [vmem:[#allocation5 + $0x1d0] ss:$8 sps:$4 sm:$0xff]   ;;  %v990_v53 = vld [vmem:[#allocation5 + $0x1e0] ss:$8 sps:$4 sm:$0xff]   ;;  %p1079_p10 = scmp.ne.s32.totalorder %s742_s23, %s1078_s24  ;;  %p1084_p12 = scmp.lt.s32.totalorder %s1078_s24, %s1078_s24 }
  0x45   :  { %v993_v55 = vld [vmem:[#allocation5 + $0x1f0] ss:$8 sps:$4 sm:$0xff]   ;;  %v996_v57 = vld [vmem:[#allocation5 + $0x200] ss:$8 sps:$4 sm:$0xff]  }
  0x46   :  { %869 = vmatpush3.bf16.msra.mxu1 %v959_v7  ;;  %v997_v58 = vld [vmem:[#allocation5 + $0x210] ss:$8 sps:$4 sm:$0xff]   ;;  %v998_v59 = vld [vmem:[#allocation5 + $0x220] ss:$8 sps:$4 sm:$0xff]   ;;  %p1085_p13 = por %p1084_p12, %p1083_p11 }
  0x47   :  { %870 = vmatprep.subr.bf16.mxu1 %v1113_v0  ;;  %885 = vmatpush3.bf16.msra.mxu0 %v965_v13  ;;  %v999_v60 = vld [vmem:[#allocation5 + $0x230] ss:$8 sps:$4 sm:$0xff]   ;;  %v1000_v61 = vld [vmem:[#allocation5 + $0x240] ss:$8 sps:$4 sm:$0xff]  }
  0x48   :  { %886 = vmatprep.subr.bf16.mxu0 %v1113_v0  ;;  %v1001_v62 = vld [vmem:[#allocation5 + $0x250] ss:$8 sps:$4 sm:$0xff]   ;;  %v256_v63 = vld [vmem:[#allocation7 + $0x2] ss:$0 sm:$0xff]  ;;  %p1086_p0 = pnand %p1085_p13, %p1079_p10 }
  0x4a   :  { %871 = vmatpush3.bf16.msra.mxu1 %v960_v8 }
  0x4b   :  { %872 = vmatprep.subr.bf16.mxu1 %v1113_v0  ;;  %887 = vmatpush3.bf16.msra.mxu0 %v966_v14  ;;  %v1002_v14 = vld [vmem:[#allocation5 + $0x260] ss:$8 sps:$4 sm:$0xff]  }
  0x4c   :  { %888 = vmatprep.subr.bf16.mxu0 %v1113_v0 }
  0x4e   :  { %873 = vmatpush3.bf16.msra.mxu1 %v961_v9 }
  0x4f   :  { %874 = vmatprep.subr.bf16.mxu1 %v1113_v0  ;;  %889 = vmatpush3.bf16.msra.mxu0 %v967_v15  ;;  %v1003_v15 = vld [vmem:[#allocation5 + $0x270] ss:$8 sps:$4 sm:$0xff]  }
  0x50   :  { %890 = vmatprep.subr.bf16.mxu0 %v1113_v0 }
  0x52   :  { %875 = vmatpush3.bf16.msra.mxu1 %v962_v10 }
  0x53   :  { %876 = vmatprep.subr.bf16.mxu1 %v1113_v0  ;;  %891 = vmatpush3.bf16.msra.mxu0 %v968_v16  ;;  %v1004_v16 = vld [vmem:[#allocation5 + $0x280] ss:$8 sps:$4 sm:$0xff]  }
  0x54   :  { %892 = vmatprep.subr.bf16.mxu0 %v1113_v0 }
  0x56   :  { %877 = vmatpush3.bf16.msra.mxu1 %v963_v11 }
  0x57   :  { %893 = vmatpush3.bf16.msra.mxu0 %v969_v17  ;;  %461 = vmatprep.subr.bf16.mxu1 %v974_v31  ;;  %v1005_v17 = vld [vmem:[#allocation5 + $0x290] ss:$8 sps:$4 sm:$0xff]  }
  0x58   :  { %894 = vmatprep.subr.bf16.mxu0 %v1113_v0 }
  0x5b   :  { %895 = vmatpush3.bf16.msra.mxu0 %v970_v28 }
  0x5c   :  { %896 = vmatprep.subr.bf16.mxu0 %v1113_v0 }
  0x5f   :  { %897 = vmatpush3.bf16.msra.mxu0 %v971_v29 }
  0x60   :  { %902 = vmatprep.subr.bf16.mxu0 %v1113_v0 }
 0x114   :  { %v117_v19 = vpop.f32.mrb[0].mxu0 }
 0x115   :  { %v118_v20 = vadd.f32 %v117_v19, %v61_v18  ;;  %v860_v21 = vpop.f32.mrb[1].mxu0  ;;  %v1007_v19 = vld [vmem:[#allocation5 + $0x2b0] ss:$8 sps:$4 sm:$0xff]  }
 0x116   :  { %v120_v22 = vpop.f32.mrb[2].mxu0  ;;  %v371_v21 = vlaneseq }
 0x117   :  { %v121_v23 = vadd.f32 %v120_v22, %v61_v18  ;;  %v861_v24 = vpop.f32.mrb[3].mxu0  ;;  %v124_v25 = vmax.f32 %v118_v20, 0.0  ;;  %v1006_v18 = vld [vmem:[#allocation5 + $0x2a0] ss:$8 sps:$4 sm:$0xff]  }
 0x118   :  { %v1008_v20 = vld [vmem:[#allocation5 + $0x2c0] ss:$8 sps:$4 sm:$0xff]   ;;  %v372_v22 = vshrl.u32 %v371_v21, 7 }
 0x119   :  { %v125_v26 = vmax.f32 %v121_v23, 0.0  ;;  %v369_v24 = vld [vmem:[#allocation7 + $0x3] ss:$8 sm:$0x3] }
 0x11a   :  { %v373_v23 = vsub.s32 0, %v372_v22 }
 0x11b   :  { %v1199_v27 = vpack.c.bf16 %v125_v26, %v124_v25 }
 0x11c   :  { %v374_v25 = vrot.slane %v369_v24, %v373_v23 }
 0x11d   :  { %879 = vmatmul.mubr.bf16.vlgmr.msra.gmra.mrb[0].mxu1 %v1199_v27  ;;  %v237_v2 = vunpack.c.l.bf16 %v1199_v27  ;;  %v238_v7 = vunpack.c.h.bf16 %v1199_v27 }
 0x11e   :  { %462 = vmatpush1.bf16.msra.mxu1 %v972_v30  ;;  %493 = vmatprep.mubr.bf16.mxu1 %v1115_v56 }
 0x11f   :  { %463 = vmatprep.subr.bf16.mxu1 %v977_v32 }
 0x122   :  { %464 = vmatpush1.bf16.msra.mxu1 %v975_v33 }
 0x123   :  { %465 = vmatprep.subr.bf16.mxu1 %v980_v34 }
 0x126   :  { %466 = vmatpush1.bf16.msra.mxu1 %v978_v35  ;;  %v1009_v35 = vld [vmem:[#allocation5 + $0x2d0] ss:$8 sps:$4 sm:$0xff]  }
 0x127   :  { %467 = vmatprep.subr.bf16.mxu1 %v983_v36  ;;  %v1010_v36 = vld [vmem:[#allocation5 + $0x2e0] ss:$8 sps:$4 sm:$0xff]  }
 0x12a   :  { %468 = vmatpush1.bf16.msra.mxu1 %v981_v37  ;;  %v1011_v37 = vld [vmem:[#allocation5 + $0x2f0] ss:$8 sps:$4 sm:$0xff]  }
 0x12b   :  { %469 = vmatprep.subr.bf16.mxu1 %v986_v38  ;;  %v377_v38 = vsub.s32 1, %v372_v22 }
 0x12e   :  { %470 = vmatpush1.bf16.msra.mxu1 %v984_v39  ;;  %v378_v39 = vrot.slane %v369_v24, %v377_v38 }
 0x12f   :  { %471 = vmatprep.subr.bf16.mxu1 %v989_v40  ;;  %v524_v40 = vld [vmem:[#allocation7 + $0x4] ss:$0 sm:$0xff] }
 0x132   :  { %472 = vmatpush1.bf16.msra.mxu1 %v987_v41 }
 0x133   :  { %473 = vmatprep.subr.bf16.mxu1 %v992_v52 }
 0x136   :  { %474 = vmatpush1.bf16.msra.mxu1 %v990_v53 }
 0x137   :  { %475 = vmatprep.subr.bf16.mxu1 %v995_v54 }
 0x13a   :  { %476 = vmatpush1.bf16.msra.mxu1 %v993_v55 }
 0x13b   :  { %922 = vmatprep.subr.bf16.mxu1 %v1113_v0 }
 0x1f0   :  { %v227_v43 = vpop.f32.mrb[0].mxu1 }
 0x1f1   :  { %v228_v44 = vadd.f32 %v227_v43, %v144_v42  ;;  %v880_v45 = vpop.f32.mrb[1].mxu1 }
 0x1f2   :  { %v230_v46 = vpop.f32.mrb[2].mxu1 }
 0x1f3   :  { %v231_v47 = vadd.f32 %v230_v46, %v144_v42  ;;  %v881_v48 = vpop.f32.mrb[3].mxu1  ;;  %v234_v49 = vmax.f32 %v228_v44, 0.0 }
 0x1f5   :  { %v235_v50 = vmax.f32 %v231_v47, 0.0 }
 0x1f7   :  { %v236_v51 = vpack.c.bf16 %v235_v50, %v234_v49 }
 0x1f9   :  { %899 = vmatmul.mubr.bf16.vlgmr.msra.gmra.mrb[4].mxu0 %v236_v51 }
 0x1fa   :  { %918 = vmatprep.mubr.msk.bf16.mxu0 %vm1114_vm0, %v1113_v0  ;;  %903 = vmatpush3.bf16.msra.mxu0 %v996_v57 }
 0x1fb   :  { %904 = vmatprep.subr.bf16.mxu0 %v1113_v0 }
 0x1fe   :  { %905 = vmatpush3.bf16.msra.mxu0 %v997_v58 }
 0x1ff   :  { %906 = vmatprep.subr.bf16.mxu0 %v1113_v0 }
 0x202   :  { %907 = vmatpush3.bf16.msra.mxu0 %v998_v59 }
 0x203   :  { %908 = vmatprep.subr.bf16.mxu0 %v1113_v0 }
 0x206   :  { %909 = vmatpush3.bf16.msra.mxu0 %v999_v60 }
 0x207   :  { %910 = vmatprep.subr.bf16.mxu0 %v1113_v0 }
 0x20a   :  { %911 = vmatpush3.bf16.msra.mxu0 %v1000_v61 }
 0x20b   :  { %912 = vmatprep.subr.bf16.mxu0 %v1113_v0 }
 0x20e   :  { %913 = vmatpush3.bf16.msra.mxu0 %v1001_v62 }
 0x20f   :  { %914 = vmatprep.subr.bf16.mxu0 %v1113_v0 }
 0x212   :  { %915 = vmatpush3.bf16.msra.mxu0 %v1002_v14 }
 0x213   :  { %916 = vmatprep.subr.bf16.mxu0 %v1113_v0 }
 0x216   :  { %917 = vmatpush3.bf16.msra.mxu0 %v1003_v15 }
 0x2cc   :  { %v339_v1 = vpop.f32.mrb[4].mxu0 }
 0x2cd   :  { %v340_v3 = vadd.f32 %v339_v1, %v256_v63  ;;  %v900_v4 = vpop.f32.mrb[5].mxu0 }
 0x2ce   :  { %v342_v5 = vpop.f32.mrb[6].mxu0 }
 0x2cf   :  { %v346_v6 = vadd.f32 %v340_v3, %v237_v2  ;;  %v343_v8 = vadd.f32 %v342_v5, %v256_v63  ;;  %v901_v9 = vpop.f32.mrb[7].mxu0 }
 0x2d1   :  { %v347_v10 = vadd.f32 %v343_v8, %v238_v7  ;;  %v348_v11 = vmax.f32 %v346_v6, 0.0 }
 0x2d3   :  { %v349_v12 = vmax.f32 %v347_v10, 0.0 }
 0x2d5   :  { %v350_v13 = vpack.c.bf16 %v349_v12, %v348_v11 }
 0x2d7   :  { %494 = vmatmul.mubr.bf16.vlgmr.msra.gmra.mrb[4].mxu1 %v350_v13 }
 0x2d8   :  { %938 = vmatprep.mubr.msk.bf16.mxu1 %vm1114_vm0, %v1113_v0  ;;  %923 = vmatpush3.bf16.msra.mxu1 %v1004_v16 }
 0x2d9   :  { %924 = vmatprep.subr.bf16.mxu1 %v1113_v0 }
 0x2dc   :  { %925 = vmatpush3.bf16.msra.mxu1 %v1005_v17 }
 0x2dd   :  { %926 = vmatprep.subr.bf16.mxu1 %v1113_v0 }
 0x2e0   :  { %927 = vmatpush3.bf16.msra.mxu1 %v1006_v18 }
 0x2e1   :  { %928 = vmatprep.subr.bf16.mxu1 %v1113_v0 }
 0x2e4   :  { %929 = vmatpush3.bf16.msra.mxu1 %v1007_v19 }
 0x2e5   :  { %930 = vmatprep.subr.bf16.mxu1 %v1113_v0 }
 0x2e8   :  { %931 = vmatpush3.bf16.msra.mxu1 %v1008_v20 }
 0x2e9   :  { %932 = vmatprep.subr.bf16.mxu1 %v1113_v0 }
 0x2ec   :  { %933 = vmatpush3.bf16.msra.mxu1 %v1009_v35 }
 0x2ed   :  { %934 = vmatprep.subr.bf16.mxu1 %v1113_v0 }
 0x2f0   :  { %935 = vmatpush3.bf16.msra.mxu1 %v1010_v36 }
 0x2f1   :  { %936 = vmatprep.subr.bf16.mxu1 %v1113_v0  ;;  %v636_v0 = vld [vmem:[#allocation7 + $0x5] ss:$0 sm:$0xff] }
 0x2f4   :  { %937 = vmatpush3.bf16.msra.mxu1 %v1011_v37 }
 0x3aa   :  { %v495_v26 = vpop.f32.mrb[4].mxu1 }
 0x3ab   :  { %v496_v27 = vadd.f32 %v495_v26, %v374_v25  ;;  %v497_v28 = vpop.f32.mrb[5].mxu1 }
 0x3ac   :  { %v499_v29 = vpop.f32.mrb[6].mxu1  ;;  %v498_v42 = vadd.f32 %v497_v28, %v378_v39 }
 0x3ad   :  { %v500_v30 = vadd.f32 %v499_v29, %v374_v25  ;;  %v501_v31 = vpop.f32.mrb[7].mxu1  ;;  %v504_v32 = vmax.f32 %v496_v27, 0.0 }
 0x3ae   :  { %v502_v46 = vadd.f32 %v501_v31, %v378_v39 }
 0x3af   :  { %v505_v33 = vmax.f32 %v500_v30, 0.0 }
 0x3b1   :  { %v506_v34 = vpack.c.bf16 %v505_v33, %v504_v32 }
 0x3b3   :  { %919 = vmatmul.mubr.bf16.vlgmr.msra.gmra.mrb[8].mxu0 %v506_v34 }
 0x486   :  { %v607_v41 = vpop.f32.mrb[8].mxu0 }
 0x487   :  { %v608_v43 = vadd.f32 %v607_v41, %v524_v40  ;;  %v920_v44 = vpop.f32.mrb[9].mxu0 }
 0x488   :  { %v610_v45 = vpop.f32.mrb[10].mxu0 }
 0x489   :  { %v614_v47 = vadd.f32 %v608_v43, %v498_v42  ;;  %v611_v48 = vadd.f32 %v610_v45, %v524_v40  ;;  %v921_v49 = vpop.f32.mrb[11].mxu0 }
 0x48b   :  { %v615_v50 = vadd.f32 %v611_v48, %v502_v46  ;;  %v616_v51 = vmax.f32 %v614_v47, 0.0 }
 0x48d   :  { %v617_v52 = vmax.f32 %v615_v50, 0.0 }
 0x48f   :  { %v618_v53 = vpack.c.bf16 %v617_v52, %v616_v51 }
 0x491   :  { %939 = vmatmul.mubr.bf16.vlgmr.msra.gmra.mrb[8].mxu1 %v618_v53 }
 0x564   :  { %v719_v54 = vpop.f32.mrb[8].mxu1 }
 0x565   :  { %v940_v55 = vpop.f32.mrb[9].mxu1  ;;  %v720_v57 = vadd.f32 %v719_v54, %v636_v0 }
 0x566   :  { %v722_v56 = vpop.f32.mrb[10].mxu1 }
 0x567   :  { %v723_v58 = vadd.f32 %v722_v56, %v636_v0  ;;  %v941_v59 = vpop.f32.mrb[11].mxu1 }
 0x569   :  { %v813_v60 = vpack.c.bf16 %v723_v58, %v720_v57 }
 0x56b   :  { %814 = vst [vmem:[#allocation8] sm:$0xff] %v813_v60  }
 0x56c   :  { %1089 = shalt.err (!%p1086_p0)
}
 0x56d   :  { %s1090_s27 = scalar_lea.hbm %s1243_s3, 128 }
 0x56e   :  { %p1091_p1 = scmp.ne.s32.totalorder %s1243_s3, %s1090_s27  ;;  %p1094_p2 = scmp.lt.u32.totalorder %s1090_s27, %s1243_s3 }
 0x570   :  { %p1096_p3 = pnand %p1094_p2, %p1091_p1 }
 0x572   :  { %1099 = shalt.err (!%p1096_p3)
}
 0x573   :  { %747 = dma.vmem_to_hbm [thread:$0]  %s742_s23, 128, %s1243_s3, [#allocation4], %s1110_s1, %s1110_s1, %s1111_s9  }
 0x574   :  { %1104 = dma.done.wait [#allocation4], 128  }
 0x575   :  { %1105 = vsyncadd [#allocation4], 4294967168 }
 0x576   :  { %751 = vsyncpa [#allocation3], 1 }
 0x577   :  { %752 = vsyncpa [#allocation6], 1 }
 0x578   :  { %753 = vsyncpa [#allocation4], 1 }

// kernel: tpu_custom_call.1
= control target key start
LH: loop header
LB: loop body
LE: loop exit
PB: predicated region body
PF: predicated region fallthrough
CT: control target
= control target key end

     0   :  { %8 = vsyncpa [#allocation3], 0  ;;  %s1240_s0 = inlined_call_operand.hbm [shape: bf16[16,32], index: 0, kind: input, shape index: {}]   ;;  %s1241_s1 = inlined_call_operand.hbm [shape: bf16[6,128,256], index: 1, kind: input, shape index: {}]   ;;  %s1242_s2 = inlined_call_operand.hbm [shape: f32[6,256], index: 2, kind: input, shape index: {}]   ;;  %s1243_s3 = inlined_call_operand.hbm [shape: bf16[16,128], index: 3, kind: output, shape index: {}]  }
   0x1   :  { %9 = vsyncpa [#allocation6], 0 }
   0x2   :  { %10 = vsyncpa [#allocation4], 0  ;;  %s1106_s12 = smov [#allocation5]   ;;  %s1012_s16 = scalar_lea.hbm %s1241_s1, 12288 }
   0x3   :  { %s28_s13 = sshll.u32 %s1106_s12, 4  ;;  %p1013_p0 = scmp.ne.s32.totalorder %s1241_s1, %s1012_s16  ;;  %s29_s13 = int_to_ptr.vmem [resolvable:$true] %s28_s13 }
   0x4   :  { %p1016_p1 = scmp.lt.u32.totalorder %s1012_s16, %s1241_s1 }
   0x6   :  { %p1018_p2 = pnand %p1016_p1, %p1013_p0 }
   0x8   :  { %1021 = shalt.err (!%p1018_p2)
}
   0x9   :  { %s1022_s21 = scalar_lea.vmem %s29_s13, 12288  ;;  %p1027_p4 = scmp.lt.s32.totalorder %s29_s13, %s29_s13 }
   0xa   :  { %p1023_p3 = scmp.ne.s32.totalorder %s29_s13, %s1022_s21  ;;  %p1028_p5 = scmp.lt.s32.totalorder %s1022_s21, %s1022_s21 }
   0xc   :  { %p1029_p6 = por %p1028_p5, %p1027_p4 }
   0xe   :  { %p1030_p7 = pnand %p1029_p6, %p1023_p3 }
  0x10   :  { %1033 = shalt.err (!%p1030_p7)
}
  0x11   :  { %s1107_s22 = smov 128   ;;  %s1108_s23 = smov 8  }
  0x12   :  { %34 = dma.hbm_to_vmem [thread:$0]  %s1241_s1, 12288, %s29_s13, [#allocation6], %s1107_s22, %s1107_s22, %s1108_s23  }
  0x13   :  { %s1109_s26 = smov [#allocation2]   ;;  %s1034_s30 = scalar_lea.hbm %s1240_s0, 128 }
  0x14   :  { %s16_s27 = sshll.u32 %s1109_s26, 4  ;;  %p1035_p8 = scmp.ne.s32.totalorder %s1240_s0, %s1034_s30  ;;  %s17_s27 = int_to_ptr.vmem [resolvable:$true] %s16_s27 }
  0x15   :  { %p1038_p9 = scmp.lt.u32.totalorder %s1034_s30, %s1240_s0 }
  0x17   :  { %p1040_p10 = pnand %p1038_p9, %p1035_p8 }
  0x19   :  { %1043 = shalt.err (!%p1040_p10)
}
  0x1a   :  { %s1044_s8 = scalar_lea.vmem %s17_s27, 128  ;;  %p1049_p12 = scmp.lt.s32.totalorder %s17_s27, %s17_s27 }
  0x1b   :  { %p1045_p11 = scmp.ne.s32.totalorder %s17_s27, %s1044_s8  ;;  %p1050_p13 = scmp.lt.s32.totalorder %s1044_s8, %s1044_s8 }
  0x1d   :  { %p1051_p0 = por %p1050_p13, %p1049_p12 }
  0x1f   :  { %p1052_p1 = pnand %p1051_p0, %p1045_p11 }
  0x21   :  { %1055 = shalt.err (!%p1052_p1)
}
  0x22   :  { %s1110_s1 = smov 64   ;;  %s1111_s9 = smov 4  }
  0x23   :  { %22 = dma.hbm_to_vmem [thread:$0]  %s1240_s0, 128, %s17_s27, [#allocation3], %s1110_s1, %s1110_s1, %s1111_s9  }
  0x24   :  { %s1112_s12 = smov [#allocation7]   ;;  %s1056_s16 = scalar_lea.hbm %s1242_s2, 256 }
  0x25   :  { %s41_s13 = sshll.u32 %s1112_s12, 4  ;;  %p1057_p2 = scmp.ne.s32.totalorder %s1242_s2, %s1056_s16  ;;  %s42_s13 = int_to_ptr.vmem [resolvable:$true] %s41_s13 }
  0x26   :  { %p1060_p3 = scmp.lt.u32.totalorder %s1056_s16, %s1242_s2 }
  0x28   :  { %p1062_p4 = pnand %p1060_p3, %p1057_p2 }
  0x2a   :  { %1065 = shalt.err (!%p1062_p4)
}
  0x2b   :  { %s1066_s21 = scalar_lea.vmem %s42_s13, 256  ;;  %p1071_p6 = scmp.lt.s32.totalorder %s42_s13, %s42_s13 }
  0x2c   :  { %p1067_p5 = scmp.ne.s32.totalorder %s42_s13, %s1066_s21  ;;  %p1072_p7 = scmp.lt.s32.totalorder %s1066_s21, %s1066_s21 }
  0x2e   :  { %p1073_p8 = por %p1072_p7, %p1071_p6 }
  0x30   :  { %p1074_p9 = pnand %p1073_p8, %p1067_p5 }
  0x32   :  { %1077 = shalt.err (!%p1074_p9)
}
  0x33   :  { %44 = dma.hbm_to_vmem [thread:$0]  %s1242_s2, 256, %s42_s13, [#allocation6]  }
  0x34   :  { %1100 = dma.done.wait [#allocation3], 128  }
  0x35   :  { %1101 = vsyncadd [#allocation3], 4294967168 }
  0x36   :  { %1102 = dma.done.wait [#allocation6], 12544  }
  0x37   :  { %1103 = vsyncadd [#allocation6], 4294954752  ;;  %v1113_v0 = vmov 0.0   ;;  %vm1114_vm0 = vmmov 0   ;;  %v953_v1 = vld [vmem:[#allocation5] ss:$8 sps:$4 sm:$0xff]  }
  0x38   :  { %854 = vmatprep.subr.bf16.mxu0 %v1113_v0  ;;  %858 = vmatprep.mubr.msk.bf16.mxu0 %vm1114_vm0, %v1113_v0  ;;  %v954_v2 = vld [vmem:[#allocation5 + $0x10] ss:$8 sps:$4 sm:$0xff]   ;;  %v956_v3 = vld [vmem:[#allocation5 + $0x80] ss:$8 sps:$4 sm:$0xff]   ;;  %vm79_vm1 = vcmask 261120   ;;  %v1115_v56 = vmov 0  }
  0x39   :  { %862 = vmatprep.subr.bf16.mxu1 %v1113_v0  ;;  %878 = vmatprep.mubr.msk.bf16.mxu1 %vm1114_vm0, %v1113_v0  ;;  %v955_v4 = vld [vmem:[#allocation2] sm:$0xff]   ;;  %v958_v6 = vld [vmem:[#allocation5 + $0xa0] ss:$8 sps:$4 sm:$0xff]   ;;  %v974_v31 = vld [vmem:[#allocation5 + $0x184] ss:$8 sps:$4 sm:$0xff]   ;;  %s1116_s2 = smov [#allocation8]  }
  0x3a   :  { %855 = vmatpush3.bf16.msra.mxu0 %v953_v1  ;;  %863 = vmatpush3.bf16.msra.mxu1 %v956_v3  ;;  %v957_v5 = vld [vmem:[#allocation5 + $0x90] ss:$8 sps:$4 sm:$0xff]   ;;  %v960_v8 = vld [vmem:[#allocation5 + $0xc0] ss:$8 sps:$4 sm:$0xff]   ;;  %v977_v32 = vld [vmem:[#allocation5 + $0x194] ss:$8 sps:$4 sm:$0xff]  }
  0x3b   :  { %856 = vmatprep.subr.bf16.mxu0 %v1113_v0  ;;  %864 = vmatprep.subr.bf16.mxu1 %v1113_v0  ;;  %v959_v7 = vld [vmem:[#allocation5 + $0xb0] ss:$8 sps:$4 sm:$0xff]   ;;  %v962_v10 = vld [vmem:[#allocation5 + $0xe0] ss:$8 sps:$4 sm:$0xff]   ;;  %v980_v34 = vld [vmem:[#allocation5 + $0x1a4] ss:$8 sps:$4 sm:$0xff]  }
  0x3c   :  { %v961_v9 = vld [vmem:[#allocation5 + $0xd0] ss:$8 sps:$4 sm:$0xff]   ;;  %v964_v12 = vld [vmem:[#allocation5 + $0x100] ss:$8 sps:$4 sm:$0xff]   ;;  %v983_v36 = vld [vmem:[#allocation5 + $0x1b4] ss:$8 sps:$4 sm:$0xff]  }
  0x3d   :  { %v963_v11 = vld [vmem:[#allocation5 + $0xf0] ss:$8 sps:$4 sm:$0xff]   ;;  %v966_v14 = vld [vmem:[#allocation5 + $0x120] ss:$8 sps:$4 sm:$0xff]   ;;  %v986_v38 = vld [vmem:[#allocation5 + $0x1c4] ss:$8 sps:$4 sm:$0xff]  }
  0x3e   :  { %857 = vmatpush3.bf16.msra.mxu0 %v954_v2  ;;  %865 = vmatpush3.bf16.msra.mxu1 %v957_v5  ;;  %v965_v13 = vld [vmem:[#allocation5 + $0x110] ss:$8 sps:$4 sm:$0xff]   ;;  %v968_v16 = vld [vmem:[#allocation5 + $0x140] ss:$8 sps:$4 sm:$0xff]   ;;  %v989_v40 = vld [vmem:[#allocation5 + $0x1d4] ss:$8 sps:$4 sm:$0xff]  }
  0x3f   :  { %882 = vmatprep.subr.bf16.mxu0 %v1113_v0  ;;  %866 = vmatprep.subr.bf16.mxu1 %v1113_v0  ;;  %v967_v15 = vld [vmem:[#allocation5 + $0x130] ss:$8 sps:$4 sm:$0xff]   ;;  %v61_v18 = vld [vmem:[#allocation7] ss:$0 sm:$0xff]  ;;  %v144_v42 = vld [vmem:[#allocation7 + $0x1] ss:$0 sm:$0xff] }
  0x40   :  { %v969_v17 = vld [vmem:[#allocation5 + $0x150] ss:$8 sps:$4 sm:$0xff]   ;;  %v970_v28 = vld [vmem:[#allocation5 + $0x160] ss:$8 sps:$4 sm:$0xff]   ;;  %v992_v52 = vld [vmem:[#allocation5 + $0x1e4] ss:$8 sps:$4 sm:$0xff]  }
  0x41   :  { %859 = vmatmul.mubr.msk.bf16.vlgmr.msra.gmra.mrb[0].mxu0 %vm79_vm1, %v955_v4  ;;  %v971_v29 = vld [vmem:[#allocation5 + $0x170] ss:$8 sps:$4 sm:$0xff]   ;;  %v972_v30 = vld [vmem:[#allocation5 + $0x180] ss:$8 sps:$4 sm:$0xff]   ;;  %v995_v54 = vld [vmem:[#allocation5 + $0x1f4] ss:$8 sps:$4 sm:$0xff]  }
  0x42   :  { %898 = vmatprep.mubr.msk.bf16.mxu0 %vm1114_vm0, %v1113_v0  ;;  %867 = vmatpush3.bf16.msra.mxu1 %v958_v6  ;;  %v975_v33 = vld [vmem:[#allocation5 + $0x190] ss:$8 sps:$4 sm:$0xff]   ;;  %v978_v35 = vld [vmem:[#allocation5 + $0x1a0] ss:$8 sps:$4 sm:$0xff]   ;;  %s741_s23 = sshll.u32 %s1116_s2, 4  ;;  %s742_s23 = int_to_ptr.vmem [resolvable:$true] %s741_s23 }
  0x43   :  { %868 = vmatprep.subr.bf16.mxu1 %v1113_v0  ;;  %883 = vmatpush3.bf16.msra.mxu0 %v964_v12  ;;  %v981_v37 = vld [vmem:[#allocation5 + $0x1b0] ss:$8 sps:$4 sm:$0xff]   ;;  %v984_v39 = vld [vmem:[#allocation5 + $0x1c0] ss:$8 sps:$4 sm:$0xff]   ;;  %s1078_s24 = scalar_lea.vmem %s742_s23, 128  ;;  %p1083_p11 = scmp.lt.s32.totalorder %s742_s23, %s742_s23 }
  0x44   :  { %884 = vmatprep.subr.bf16.mxu0 %v1113_v0  ;;  %v987_v41 = vld [vmem:[#allocation5 + $0x1d0] ss:$8 sps:$4 sm:$0xff]   ;;  %v990_v53 = vld [vmem:[#allocation5 + $0x1e0] ss:$8 sps:$4 sm:$0xff]   ;;  %p1079_p10 = scmp.ne.s32.totalorder %s742_s23, %s1078_s24  ;;  %p1084_p12 = scmp.lt.s32.totalorder %s1078_s24, %s1078_s24 }
  0x45   :  { %v993_v55 = vld [vmem:[#allocation5 + $0x1f0] ss:$8 sps:$4 sm:$0xff]   ;;  %v996_v57 = vld [vmem:[#allocation5 + $0x200] ss:$8 sps:$4 sm:$0xff]  }
  0x46   :  { %869 = vmatpush3.bf16.msra.mxu1 %v959_v7  ;;  %v997_v58 = vld [vmem:[#allocation5 + $0x210] ss:$8 sps:$4 sm:$0xff]   ;;  %v998_v59 = vld [vmem:[#allocation5 + $0x220] ss:$8 sps:$4 sm:$0xff]   ;;  %p1085_p13 = por %p1084_p12, %p1083_p11 }
  0x47   :  { %870 = vmatprep.subr.bf16.mxu1 %v1113_v0  ;;  %885 = vmatpush3.bf16.msra.mxu0 %v965_v13  ;;  %v999_v60 = vld [vmem:[#allocation5 + $0x230] ss:$8 sps:$4 sm:$0xff]   ;;  %v1000_v61 = vld [vmem:[#allocation5 + $0x240] ss:$8 sps:$4 sm:$0xff]  }
  0x48   :  { %886 = vmatprep.subr.bf16.mxu0 %v1113_v0  ;;  %v1001_v62 = vld [vmem:[#allocation5 + $0x250] ss:$8 sps:$4 sm:$0xff]   ;;  %v256_v63 = vld [vmem:[#allocation7 + $0x2] ss:$0 sm:$0xff]  ;;  %p1086_p0 = pnand %p1085_p13, %p1079_p10 }
  0x4a   :  { %871 = vmatpush3.bf16.msra.mxu1 %v960_v8 }
  0x4b   :  { %872 = vmatprep.subr.bf16.mxu1 %v1113_v0  ;;  %887 = vmatpush3.bf16.msra.mxu0 %v966_v14  ;;  %v1002_v14 = vld [vmem:[#allocation5 + $0x260] ss:$8 sps:$4 sm:$0xff]  }
  0x4c   :  { %888 = vmatprep.subr.bf16.mxu0 %v1113_v0 }
  0x4e   :  { %873 = vmatpush3.bf16.msra.mxu1 %v961_v9 }
  0x4f   :  { %874 = vmatprep.subr.bf16.mxu1 %v1113_v0  ;;  %889 = vmatpush3.bf16.msra.mxu0 %v967_v15  ;;  %v1003_v15 = vld [vmem:[#allocation5 + $0x270] ss:$8 sps:$4 sm:$0xff]  }
  0x50   :  { %890 = vmatprep.subr.bf16.mxu0 %v1113_v0 }
  0x52   :  { %875 = vmatpush3.bf16.msra.mxu1 %v962_v10 }
  0x53   :  { %876 = vmatprep.subr.bf16.mxu1 %v1113_v0  ;;  %891 = vmatpush3.bf16.msra.mxu0 %v968_v16  ;;  %v1004_v16 = vld [vmem:[#allocation5 + $0x280] ss:$8 sps:$4 sm:$0xff]  }
  0x54   :  { %892 = vmatprep.subr.bf16.mxu0 %v1113_v0 }
  0x56   :  { %877 = vmatpush3.bf16.msra.mxu1 %v963_v11 }
  0x57   :  { %893 = vmatpush3.bf16.msra.mxu0 %v969_v17  ;;  %461 = vmatprep.subr.bf16.mxu1 %v974_v31  ;;  %v1005_v17 = vld [vmem:[#allocation5 + $0x290] ss:$8 sps:$4 sm:$0xff]  }
  0x58   :  { %894 = vmatprep.subr.bf16.mxu0 %v1113_v0 }
  0x5b   :  { %895 = vmatpush3.bf16.msra.mxu0 %v970_v28 }
  0x5c   :  { %896 = vmatprep.subr.bf16.mxu0 %v1113_v0 }
  0x5f   :  { %897 = vmatpush3.bf16.msra.mxu0 %v971_v29 }
  0x60   :  { %902 = vmatprep.subr.bf16.mxu0 %v1113_v0 }
 0x114   :  { %v117_v19 = vpop.f32.mrb[0].mxu0 }
 0x115   :  { %v118_v20 = vadd.f32 %v117_v19, %v61_v18  ;;  %v860_v21 = vpop.f32.mrb[1].mxu0  ;;  %v1007_v19 = vld [vmem:[#allocation5 + $0x2b0] ss:$8 sps:$4 sm:$0xff]  }
 0x116   :  { %v120_v22 = vpop.f32.mrb[2].mxu0  ;;  %v371_v21 = vlaneseq }
 0x117   :  { %v121_v23 = vadd.f32 %v120_v22, %v61_v18  ;;  %v861_v24 = vpop.f32.mrb[3].mxu0  ;;  %v124_v25 = vmax.f32 %v118_v20, 0.0  ;;  %v1006_v18 = vld [vmem:[#allocation5 + $0x2a0] ss:$8 sps:$4 sm:$0xff]  }
 0x118   :  { %v1008_v20 = vld [vmem:[#allocation5 + $0x2c0] ss:$8 sps:$4 sm:$0xff]   ;;  %v372_v22 = vshrl.u32 %v371_v21, 7 }
 0x119   :  { %v125_v26 = vmax.f32 %v121_v23, 0.0  ;;  %v369_v24 = vld [vmem:[#allocation7 + $0x3] ss:$8 sm:$0x3] }
 0x11a   :  { %v373_v23 = vsub.s32 0, %v372_v22 }
 0x11b   :  { %v1199_v27 = vpack.c.bf16 %v125_v26, %v124_v25 }
 0x11c   :  { %v374_v25 = vrot.slane %v369_v24, %v373_v23 }
 0x11d   :  { %879 = vmatmul.mubr.bf16.vlgmr.msra.gmra.mrb[0].mxu1 %v1199_v27  ;;  %v237_v2 = vunpack.c.l.bf16 %v1199_v27  ;;  %v238_v7 = vunpack.c.h.bf16 %v1199_v27 }
 0x11e   :  { %462 = vmatpush1.bf16.msra.mxu1 %v972_v30  ;;  %493 = vmatprep.mubr.bf16.mxu1 %v1115_v56 }
 0x11f   :  { %463 = vmatprep.subr.bf16.mxu1 %v977_v32 }
 0x122   :  { %464 = vmatpush1.bf16.msra.mxu1 %v975_v33 }
 0x123   :  { %465 = vmatprep.subr.bf16.mxu1 %v980_v34 }
 0x126   :  { %466 = vmatpush1.bf16.msra.mxu1 %v978_v35  ;;  %v1009_v35 = vld [vmem:[#allocation5 + $0x2d0] ss:$8 sps:$4 sm:$0xff]  }
 0x127   :  { %467 = vmatprep.subr.bf16.mxu1 %v983_v36  ;;  %v1010_v36 = vld [vmem:[#allocation5 + $0x2e0] ss:$8 sps:$4 sm:$0xff]  }
 0x12a   :  { %468 = vmatpush1.bf16.msra.mxu1 %v981_v37  ;;  %v1011_v37 = vld [vmem:[#allocation5 + $0x2f0] ss:$8 sps:$4 sm:$0xff]  }
 0x12b   :  { %469 = vmatprep.subr.bf16.mxu1 %v986_v38  ;;  %v377_v38 = vsub.s32 1, %v372_v22 }
 0x12e   :  { %470 = vmatpush1.bf16.msra.mxu1 %v984_v39  ;;  %v378_v39 = vrot.slane %v369_v24, %v377_v38 }
 0x12f   :  { %471 = vmatprep.subr.bf16.mxu1 %v989_v40  ;;  %v524_v40 = vld [vmem:[#allocation7 + $0x4] ss:$0 sm:$0xff] }
 0x132   :  { %472 = vmatpush1.bf16.msra.mxu1 %v987_v41 }
 0x133   :  { %473 = vmatprep.subr.bf16.mxu1 %v992_v52 }
 0x136   :  { %474 = vmatpush1.bf16.msra.mxu1 %v990_v53 }
 0x137   :  { %475 = vmatprep.subr.bf16.mxu1 %v995_v54 }
 0x13a   :  { %476 = vmatpush1.bf16.msra.mxu1 %v993_v55 }
 0x13b   :  { %922 = vmatprep.subr.bf16.mxu1 %v1113_v0 }
 0x1f0   :  { %v227_v43 = vpop.f32.mrb[0].mxu1 }
 0x1f1   :  { %v228_v44 = vadd.f32 %v227_v43, %v144_v42  ;;  %v880_v45 = vpop.f32.mrb[1].mxu1 }
 0x1f2   :  { %v230_v46 = vpop.f32.mrb[2].mxu1 }
 0x1f3   :  { %v231_v47 = vadd.f32 %v230_v46, %v144_v42  ;;  %v881_v48 = vpop.f32.mrb[3].mxu1  ;;  %v234_v49 = vmax.f32 %v228_v44, 0.0 }
 0x1f5   :  { %v235_v50 = vmax.f32 %v231_v47, 0.0 }
 0x1f7   :  { %v236_v51 = vpack.c.bf16 %v235_v50, %v234_v49 }
 0x1f9   :  { %899 = vmatmul.mubr.bf16.vlgmr.msra.gmra.mrb[4].mxu0 %v236_v51 }
 0x1fa   :  { %918 = vmatprep.mubr.msk.bf16.mxu0 %vm1114_vm0, %v1113_v0  ;;  %903 = vmatpush3.bf16.msra.mxu0 %v996_v57 }
 0x1fb   :  { %904 = vmatprep.subr.bf16.mxu0 %v1113_v0 }
 0x1fe   :  { %905 = vmatpush3.bf16.msra.mxu0 %v997_v58 }
 0x1ff   :  { %906 = vmatprep.subr.bf16.mxu0 %v1113_v0 }
 0x202   :  { %907 = vmatpush3.bf16.msra.mxu0 %v998_v59 }
 0x203   :  { %908 = vmatprep.subr.bf16.mxu0 %v1113_v0 }
 0x206   :  { %909 = vmatpush3.bf16.msra.mxu0 %v999_v60 }
 0x207   :  { %910 = vmatprep.subr.bf16.mxu0 %v1113_v0 }
 0x20a   :  { %911 = vmatpush3.bf16.msra.mxu0 %v1000_v61 }
 0x20b   :  { %912 = vmatprep.subr.bf16.mxu0 %v1113_v0 }
 0x20e   :  { %913 = vmatpush3.bf16.msra.mxu0 %v1001_v62 }
 0x20f   :  { %914 = vmatprep.subr.bf16.mxu0 %v1113_v0 }
 0x212   :  { %915 = vmatpush3.bf16.msra.mxu0 %v1002_v14 }
 0x213   :  { %916 = vmatprep.subr.bf16.mxu0 %v1113_v0 }
 0x216   :  { %917 = vmatpush3.bf16.msra.mxu0 %v1003_v15 }
 0x2cc   :  { %v339_v1 = vpop.f32.mrb[4].mxu0 }
 0x2cd   :  { %v340_v3 = vadd.f32 %v339_v1, %v256_v63  ;;  %v900_v4 = vpop.f32.mrb[5].mxu0 }
 0x2ce   :  { %v342_v5 = vpop.f32.mrb[6].mxu0 }
 0x2cf   :  { %v346_v6 = vadd.f32 %v340_v3, %v237_v2  ;;  %v343_v8 = vadd.f32 %v342_v5, %v256_v63  ;;  %v901_v9 = vpop.f32.mrb[7].mxu0 }
 0x2d1   :  { %v347_v10 = vadd.f32 %v343_v8, %v238_v7  ;;  %v348_v11 = vmax.f32 %v346_v6, 0.0 }
 0x2d3   :  { %v349_v12 = vmax.f32 %v347_v10, 0.0 }
 0x2d5   :  { %v350_v13 = vpack.c.bf16 %v349_v12, %v348_v11 }
 0x2d7   :  { %494 = vmatmul.mubr.bf16.vlgmr.msra.gmra.mrb[4].mxu1 %v350_v13 }
 0x2d8   :  { %938 = vmatprep.mubr.msk.bf16.mxu1 %vm1114_vm0, %v1113_v0  ;;  %923 = vmatpush3.bf16.msra.mxu1 %v1004_v16 }
 0x2d9   :  { %924 = vmatprep.subr.bf16.mxu1 %v1113_v0 }
 0x2dc   :  { %925 = vmatpush3.bf16.msra.mxu1 %v1005_v17 }
 0x2dd   :  { %926 = vmatprep.subr.bf16.mxu1 %v1113_v0 }
 0x2e0   :  { %927 = vmatpush3.bf16.msra.mxu1 %v1006_v18 }
 0x2e1   :  { %928 = vmatprep.subr.bf16.mxu1 %v1113_v0 }
 0x2e4   :  { %929 = vmatpush3.bf16.msra.mxu1 %v1007_v19 }
 0x2e5   :  { %930 = vmatprep.subr.bf16.mxu1 %v1113_v0 }
 0x2e8   :  { %931 = vmatpush3.bf16.msra.mxu1 %v1008_v20 }
 0x2e9   :  { %932 = vmatprep.subr.bf16.mxu1 %v1113_v0 }
 0x2ec   :  { %933 = vmatpush3.bf16.msra.mxu1 %v1009_v35 }
 0x2ed   :  { %934 = vmatprep.subr.bf16.mxu1 %v1113_v0 }
 0x2f0   :  { %935 = vmatpush3.bf16.msra.mxu1 %v1010_v36 }
 0x2f1   :  { %936 = vmatprep.subr.bf16.mxu1 %v1113_v0  ;;  %v636_v0 = vld [vmem:[#allocation7 + $0x5] ss:$0 sm:$0xff] }
 0x2f4   :  { %937 = vmatpush3.bf16.msra.mxu1 %v1011_v37 }
 0x3aa   :  { %v495_v26 = vpop.f32.mrb[4].mxu1 }
 0x3ab   :  { %v496_v27 = vadd.f32 %v495_v26, %v374_v25  ;;  %v497_v28 = vpop.f32.mrb[5].mxu1 }
 0x3ac   :  { %v499_v29 = vpop.f32.mrb[6].mxu1  ;;  %v498_v42 = vadd.f32 %v497_v28, %v378_v39 }
 0x3ad   :  { %v500_v30 = vadd.f32 %v499_v29, %v374_v25  ;;  %v501_v31 = vpop.f32.mrb[7].mxu1  ;;  %v504_v32 = vmax.f32 %v496_v27, 0.0 }
 0x3ae   :  { %v502_v46 = vadd.f32 %v501_v31, %v378_v39 }
 0x3af   :  { %v505_v33 = vmax.f32 %v500_v30, 0.0 }
 0x3b1   :  { %v506_v34 = vpack.c.bf16 %v505_v33, %v504_v32 }
 0x3b3   :  { %919 = vmatmul.mubr.bf16.vlgmr.msra.gmra.mrb[8].mxu0 %v506_v34 }
 0x486   :  { %v607_v41 = vpop.f32.mrb[8].mxu0 }
 0x487   :  { %v608_v43 = vadd.f32 %v607_v41, %v524_v40  ;;  %v920_v44 = vpop.f32.mrb[9].mxu0 }
 0x488   :  { %v610_v45 = vpop.f32.mrb[10].mxu0 }
 0x489   :  { %v614_v47 = vadd.f32 %v608_v43, %v498_v42  ;;  %v611_v48 = vadd.f32 %v610_v45, %v524_v40  ;;  %v921_v49 = vpop.f32.mrb[11].mxu0 }
 0x48b   :  { %v615_v50 = vadd.f32 %v611_v48, %v502_v46  ;;  %v616_v51 = vmax.f32 %v614_v47, 0.0 }
 0x48d   :  { %v617_v52 = vmax.f32 %v615_v50, 0.0 }
 0x48f   :  { %v618_v53 = vpack.c.bf16 %v617_v52, %v616_v51 }
 0x491   :  { %939 = vmatmul.mubr.bf16.vlgmr.msra.gmra.mrb[8].mxu1 %v618_v53 }
 0x564   :  { %v719_v54 = vpop.f32.mrb[8].mxu1 }
 0x565   :  { %v940_v55 = vpop.f32.mrb[9].mxu1  ;;  %v720_v57 = vadd.f32 %v719_v54, %v636_v0 }
 0x566   :  { %v722_v56 = vpop.f32.mrb[10].mxu1 }
 0x567   :  { %v723_v58 = vadd.f32 %v722_v56, %v636_v0  ;;  %v941_v59 = vpop.f32.mrb[11].mxu1 }
 0x569   :  { %v813_v60 = vpack.c.bf16 %v723_v58, %v720_v57 }
 0x56b   :  { %814 = vst [vmem:[#allocation8] sm:$0xff] %v813_v60  }
 0x56c   :  { %1089 = shalt.err (!%p1086_p0)
}
 0x56d   :  { %s1090_s27 = scalar_lea.hbm %s1243_s3, 128 }
 0x56e   :  { %p1091_p1 = scmp.ne.s32.totalorder %s1243_s3, %s1090_s27  ;;  %p1094_p2 = scmp.lt.u32.totalorder %s1090_s27, %s1243_s3 }
 0x570   :  { %p1096_p3 = pnand %p1094_p2, %p1091_p1 }
 0x572   :  { %1099 = shalt.err (!%p1096_p3)
}
 0x573   :  { %747 = dma.vmem_to_hbm [thread:$0]  %s742_s23, 128, %s1243_s3, [#allocation4], %s1110_s1, %s1110_s1, %s1111_s9  }
 0x574   :  { %1104 = dma.done.wait [#allocation4], 128  }
 0x575   :  { %1105 = vsyncadd [#allocation4], 4294967168 }
 0x576   :  { %751 = vsyncpa [#allocation3], 1 }
 0x577   :  { %752 = vsyncpa [#allocation6], 1 }
 0x578   :  { %753 = vsyncpa [#allocation4], 1 }

</bundles_post_ra>
